<compile_context>
chip_gen: v7x
topology: tpu7x:2x2x1
jax: 0.10.0
libtpu: 0.0.40
codegen_flags: <defaults>
</compile_context>

<pallas_src>
import functools

import jax
import jax.numpy as jnp
from jax.experimental import pallas as pl
from jax.experimental.pallas import tpu as pltpu

LANES = 128            # padded lane width for hidden / output features
HID1, HID2 = 32, 20    # logical hidden sizes of PolicyNet

_TB_MAX = 1024         # big tiles amortize the ~0.35 us per-grid-step overhead
_TB_SPLIT_MIN = 512    # only force >=2 grid steps (v7x 2-TC sharding) past this


def _round_up(x, m):
    return (x + m - 1) // m * m


def _cdiv(a, b):
    return -(-a // b)


def _batch_tiling(B):
    """Pick (TB, grid) : TB multiple of 8, grid = cdiv(B, TB), tail masked by Pallas."""
    b8 = _round_up(B, 8)
    if b8 <= _TB_SPLIT_MIN:
        tb = b8                                   # one tile covers the batch
    else:
        n_tiles = max(2, _cdiv(b8, _TB_MAX))      # >=2 steps so both v7x TCs work
        tb = _round_up(_cdiv(b8, n_tiles), 8)     # tight tiles, no full padded tile
    return tb, _cdiv(B, tb)


# --------------------------------------------------------------------------
# Kernel
# --------------------------------------------------------------------------
def _policy_kernel(x_ref, p_ref, o_ref, *, obs_dim, bias_row, out_size):
    P = LANES
    f32 = jnp.float32

    x = x_ref[...]                                            # (TB, obs_dim) f32

    # Bias rows of the bf16 slab (single-sublane slices -> cheap masked loads).
    b1 = p_ref[bias_row:bias_row + 1, 0:P].astype(f32)        # (1, P)
    b2 = p_ref[bias_row:bias_row + 1, P:2 * P].astype(f32)    # (1, P)
    b3 = p_ref[bias_row:bias_row + 1, 2 * P:3 * P].astype(f32)  # (1, P); pad lanes -1e30

    # ---- fc1 + relu ------------------------------------------------------
    if obs_dim <= 32:
        # Tiny contraction: unrolled VPU outer-product (f32) beats an MXU pass
        # that would use only obs_dim/128 of the systolic array.
        h1 = b1 + x[:, 0:1] * p_ref[0:1, 0:P].astype(f32)
        for i in range(1, obs_dim):
            h1 = h1 + x[:, i:i + 1] * p_ref[i:i + 1, 0:P].astype(f32)
    else:
        w1 = p_ref[0:obs_dim, 0:P]                            # (obs_dim, P) bf16
        h1 = jnp.dot(x.astype(jnp.bfloat16), w1,
                     preferred_element_type=f32) + b1
    h1 = jnp.maximum(h1, 0.0)                                 # padded lanes stay 0

    # ---- fc2 + relu : bf16 MXU operands, f32 accumulation ---------------
    w2 = p_ref[0:P, P:2 * P]                                  # (P, P) bf16
    h2 = jnp.maximum(
        jnp.dot(h1.astype(jnp.bfloat16), w2, preferred_element_type=f32) + b2,
        0.0)

    # ---- fc3 + softmax over the lane axis --------------------------------
    # Padded logit lanes get bias -1e30 (zero weight columns), so they vanish
    # from max / exp / sum.
    w3 = p_ref[0:P, 2 * P:3 * P]                              # (P, P) bf16
    logits = jnp.dot(h2.astype(jnp.bfloat16), w3, preferred_element_type=f32) + b3
    m = jnp.max(logits, axis=-1, keepdims=True)
    e = jnp.exp(logits - m)
    denom = jnp.sum(e, axis=-1, keepdims=True)
    inv = pl.reciprocal(denom, approx=True)                   # EUP vrcp (free slot)
    inv = inv * (2.0 - denom * inv)                           # Newton: f32-accurate rows
    # Emit only the real action lanes -> 4*out_size B/row HBM writeback.
    o_ref[...] = (e * inv)[:, :out_size].astype(o_ref.dtype)


# --------------------------------------------------------------------------
# Wrapper
# --------------------------------------------------------------------------
@functools.partial(jax.jit, static_argnames=("out_size", "bias_row"))
def policy_net_forward(x, packed, *, out_size, bias_row):
    """x: [B, obs_dim] f32; packed: bf16 param slab from pack_params; -> [B, out_size] f32."""
    B, obs_dim = x.shape
    TB, grid = _batch_tiling(B)

    kernel = functools.partial(_policy_kernel, obs_dim=obs_dim,
                               bias_row=bias_row, out_size=out_size)

    cost = pl.CostEstimate(
        flops=2 * B * (obs_dim * LANES + 2 * LANES * LANES),
        transcendentals=B * LANES,
        bytes_accessed=x.size * x.dtype.itemsize
        + packed.size * packed.dtype.itemsize
        + B * out_size * 4,
    )

    return pl.pallas_call(
        kernel,
        out_shape=jax.ShapeDtypeStruct((B, out_size), jnp.float32),
        grid=(grid,),
        in_specs=[
            # x tile: last dim == full array dim, TB multiple of 8; tail masked.
            pl.BlockSpec((TB, obs_dim), lambda i: (i, 0)),
            # Parameter slab: constant index_map -> stays VMEM-resident.
            pl.BlockSpec(packed.shape, lambda i: (0, 0)),
        ],
        out_specs=pl.BlockSpec((TB, out_size), lambda i: (i, 0)),
        compiler_params=pltpu.CompilerParams(
            dimension_semantics=("parallel",)),
        cost_estimate=cost,
    )(x, packed)


# --------------------------------------------------------------------------
# Parameter init / packing
# --------------------------------------------------------------------------
def pack_params(w1, b1, w2, b2, w3, b3):
    """Pack all layers into one bf16 slab; returns (slab, bias_row).

    cols [0:128)   : fc1  (w1 in rows 0:obs_dim, b1 in row bias_row)
    cols [128:256) : fc2  (w2 in rows 0:32,      b2 in row bias_row)
    cols [256:384) : fc3  (w3 in rows 0:20,      b3 in row bias_row; pad lanes -1e30)

    NOTE: the -1e30 padded-fc3-bias trick is only correct because the slab is
    built from jnp.zeros (padded w1 rows / w3 columns are exactly 0).  Never
    re-pack into reused/uninitialized memory.
    """
    P = LANES
    obs_dim = w1.shape[0]
    out_size = w3.shape[1]
    assert w1.shape[1] <= P and w2.shape[1] <= P and out_size <= P

    bias_row = max(_round_up(obs_dim, 8), P)
    rows = _round_up(bias_row + 1, 16)            # bf16 sublane-tile aligned
    slab = jnp.zeros((rows, 3 * P), jnp.float32)  # MUST be zero-initialized
    slab = slab.at[:obs_dim, 0:w1.shape[1]].set(w1)
    slab = slab.at[bias_row, 0:b1.shape[0]].set(b1)
    slab = slab.at[:w2.shape[0], P:P + w2.shape[1]].set(w2)
    slab = slab.at[bias_row, P:P + b2.shape[0]].set(b2)
    slab = slab.at[:w3.shape[0], 2 * P:2 * P + w3.shape[1]].set(w3)
    b3_row = jnp.full((P,), -1e30, jnp.float32).at[:out_size].set(b3)
    slab = slab.at[bias_row, 2 * P:3 * P].set(b3_row)
    return slab.astype(jnp.bfloat16), bias_row


def init_params(key, obs_dim, output_size):
    """nn.Linear-style init (uniform(-1/sqrt(fan_in), +)), stored as [in, out]."""
    def linear(key, fan_in, fan_out):
        kw, kb = jax.random.split(key)
        bound = 1.0 / jnp.sqrt(fan_in)
        w = jax.random.uniform(kw, (fan_in, fan_out), jnp.float32, -bound, bound)
        b = jax.random.uniform(kb, (fan_out,), jnp.float32, -bound, bound)
        return w, b

    k1, k2, k3 = jax.random.split(key, 3)
    w1, b1 = linear(k1, obs_dim, HID1)
    w2, b2 = linear(k2, HID1, HID2)
    w3, b3 = linear(k3, HID2, output_size)
    packed, bias_row = pack_params(w1, b1, w2, b2, w3, b3)
    return {"w1": w1, "b1": b1, "w2": w2, "b2": b2, "w3": w3, "b3": b3,
            "packed": packed, "bias_row": bias_row}


def reference_forward(x, params):
    """Exact f32 PolicyNet semantics (mirrors the PyTorch module)."""
    h1 = jnp.maximum(x @ params["w1"] + params["b1"], 0.0)
    h2 = jnp.maximum(h1 @ params["w2"] + params["b2"], 0.0)
    logits = h2 @ params["w3"] + params["b3"]
    return jax.nn.softmax(logits, axis=-1)


def reference_forward_matched(x, params):
    """Same bf16 weight/activation rounding as the kernel, f32 accumulation."""
    q = lambda a: a.astype(jnp.bfloat16).astype(jnp.float32)
    h1 = jnp.maximum(x @ q(params["w1"]) + q(params["b1"]), 0.0)
    h2 = jnp.maximum(q(h1) @ q(params["w2"]) + q(params["b2"]), 0.0)
    logits = q(h2) @ q(params["w3"]) + q(params["b3"])
    return jax.nn.softmax(logits, axis=-1)


if __name__ == "__main__":
    key = jax.random.PRNGKey(0)
    kx, kx2, kp = jax.random.split(key, 3)

    batch, obs_dim, output_size = 8, 4, 6      # obs_shape = (4,), action space = 6
    params = init_params(kp, obs_dim, output_size)

    # --- small batch: single tile -----------------------------------------
    x = jax.random.normal(kx, (batch, obs_dim), jnp.float32)
    out = policy_net_forward(x, params["packed"],
                             out_size=output_size, bias_row=params["bias_row"])
    out = jax.block_until_ready(out)

    ref = reference_forward(x, params)
    ref_q = reference_forward_matched(x, params)
    assert out.shape == (batch, output_size)
    assert jnp.allclose(jnp.sum(out, axis=-1), 1.0, atol=1e-4)
    # Same-math check (bf16-rounded weights/activations, f32 accumulation).
    assert jnp.allclose(out, ref_q, atol=5e-3, rtol=5e-3), \
        float(jnp.max(jnp.abs(out - ref_q)))
    # Semantic check vs the f32 module (loose: bf16 weight quantization).
    assert jnp.allclose(out, ref, atol=3e-2, rtol=3e-2), \
        float(jnp.max(jnp.abs(out - ref)))

    # --- larger batch: multi-step "parallel" grid + masked tail tile -------
    batch2 = 600                                # -> TB=304, grid=2, partial tail
    x2 = jax.random.normal(kx2, (batch2, obs_dim), jnp.float32)
    out2 = policy_net_forward(x2, params["packed"],
                              out_size=output_size, bias_row=params["bias_row"])
    out2 = jax.block_until_ready(out2)
    ref2_q = reference_forward_matched(x2, params)
    assert out2.shape == (batch2, output_size)
    assert jnp.allclose(jnp.sum(out2, axis=-1), 1.0, atol=1e-4)
    assert jnp.allclose(out2, ref2_q, atol=5e-3, rtol=5e-3), \
        float(jnp.max(jnp.abs(out2 - ref2_q)))

    print("KERNEL_OK")
</pallas_src>

<mosaic_0001>
module attributes {stable_mosaic.version = 11 : i64} {
  func.func @_policy_kernel(%arg0: i32, %arg1: memref<8x4xf32, #tpu.memory_space<vmem>>, %arg2: memref<144x384xbf16, #tpu.memory_space<vmem>>, %arg3: memref<8x6xf32, #tpu.memory_space<vmem>>) attributes {dimension_semantics = [#tpu.dimension_semantics<parallel>], iteration_bounds = array<i64: 1>, scalar_prefetch = 0 : i64, scratch_operands = 0 : i64, tpu.core_type = #tpu.core_type<tc>, window_params = [{transform_indices = @transform_0, window_bounds = array<i64: 8, 4>}, {pipeline_mode = #tpu.pipeline_mode<synchronous>, transform_indices = @transform_1, window_bounds = array<i64: 144, 384>}, {transform_indices = @transform_2, window_bounds = array<i64: 8, 6>}]} {
    %c0 = arith.constant 0 : index
    %c0_0 = arith.constant 0 : index
    %0 = vector.load %arg1[%c0, %c0_0] : memref<8x4xf32, #tpu.memory_space<vmem>>, vector<8x4xf32>
    %c128 = arith.constant 128 : index
    %c0_1 = arith.constant 0 : index
    %1 = vector.load %arg2[%c128, %c0_1] : memref<144x384xbf16, #tpu.memory_space<vmem>>, vector<1x128xbf16>
    %2 = arith.extf %1 : vector<1x128xbf16> to vector<1x128xf32>
    %c128_2 = arith.constant 128 : index
    %c128_3 = arith.constant 128 : index
    %3 = vector.load %arg2[%c128_2, %c128_3] : memref<144x384xbf16, #tpu.memory_space<vmem>>, vector<1x128xbf16>
    %4 = arith.extf %3 : vector<1x128xbf16> to vector<1x128xf32>
    %c128_4 = arith.constant 128 : index
    %c256 = arith.constant 256 : index
    %5 = vector.load %arg2[%c128_4, %c256] : memref<144x384xbf16, #tpu.memory_space<vmem>>, vector<1x128xbf16>
    %6 = arith.extf %5 : vector<1x128xbf16> to vector<1x128xf32>
    %7 = vector.extract_strided_slice %0 {offsets = [0, 0], sizes = [8, 1], strides = [1, 1]} : vector<8x4xf32> to vector<8x1xf32>
    %c0_5 = arith.constant 0 : index
    %c0_6 = arith.constant 0 : index
    %8 = vector.load %arg2[%c0_5, %c0_6] : memref<144x384xbf16, #tpu.memory_space<vmem>>, vector<1x128xbf16>
    %9 = arith.extf %8 : vector<1x128xbf16> to vector<1x128xf32>
    %10 = vector.broadcast %7 : vector<8x1xf32> to vector<8x128xf32>
    %11 = vector.broadcast %9 : vector<1x128xf32> to vector<8x128xf32>
    %12 = arith.mulf %10, %11 : vector<8x128xf32>
    %13 = vector.broadcast %2 : vector<1x128xf32> to vector<8x128xf32>
    %14 = arith.addf %13, %12 : vector<8x128xf32>
    %15 = vector.extract_strided_slice %0 {offsets = [0, 1], sizes = [8, 1], strides = [1, 1]} : vector<8x4xf32> to vector<8x1xf32>
    %c1 = arith.constant 1 : index
    %c0_7 = arith.constant 0 : index
    %16 = vector.load %arg2[%c1, %c0_7] : memref<144x384xbf16, #tpu.memory_space<vmem>>, vector<1x128xbf16>
    %17 = arith.extf %16 : vector<1x128xbf16> to vector<1x128xf32>
    %18 = vector.broadcast %15 : vector<8x1xf32> to vector<8x128xf32>
    %19 = vector.broadcast %17 : vector<1x128xf32> to vector<8x128xf32>
    %20 = arith.mulf %18, %19 : vector<8x128xf32>
    %21 = arith.addf %14, %20 : vector<8x128xf32>
    %22 = vector.extract_strided_slice %0 {offsets = [0, 2], sizes = [8, 1], strides = [1, 1]} : vector<8x4xf32> to vector<8x1xf32>
    %c2 = arith.constant 2 : index
    %c0_8 = arith.constant 0 : index
    %23 = vector.load %arg2[%c2, %c0_8] : memref<144x384xbf16, #tpu.memory_space<vmem>>, vector<1x128xbf16>
    %24 = arith.extf %23 : vector<1x128xbf16> to vector<1x128xf32>
    %25 = vector.broadcast %22 : vector<8x1xf32> to vector<8x128xf32>
    %26 = vector.broadcast %24 : vector<1x128xf32> to vector<8x128xf32>
    %27 = arith.mulf %25, %26 : vector<8x128xf32>
    %28 = arith.addf %21, %27 : vector<8x128xf32>
    %29 = vector.extract_strided_slice %0 {offsets = [0, 3], sizes = [8, 1], strides = [1, 1]} : vector<8x4xf32> to vector<8x1xf32>
    %c3 = arith.constant 3 : index
    %c0_9 = arith.constant 0 : index
    %30 = vector.load %arg2[%c3, %c0_9] : memref<144x384xbf16, #tpu.memory_space<vmem>>, vector<1x128xbf16>
    %31 = arith.extf %30 : vector<1x128xbf16> to vector<1x128xf32>
    %32 = vector.broadcast %29 : vector<8x1xf32> to vector<8x128xf32>
    %33 = vector.broadcast %31 : vector<1x128xf32> to vector<8x128xf32>
    %34 = arith.mulf %32, %33 : vector<8x128xf32>
    %35 = arith.addf %28, %34 : vector<8x128xf32>
    %cst = arith.constant 0.000000e+00 : f32
    %36 = vector.broadcast %cst : f32 to vector<8x128xf32>
    %37 = arith.maximumf %35, %36 : vector<8x128xf32>
    %c0_10 = arith.constant 0 : index
    %c128_11 = arith.constant 128 : index
    %38 = vector.load %arg2[%c0_10, %c128_11] : memref<144x384xbf16, #tpu.memory_space<vmem>>, vector<128x128xbf16>
    %39 = arith.truncf %37 : vector<8x128xf32> to vector<8x128xbf16>
    %cst_12 = arith.constant dense<0.000000e+00> : vector<8x128xf32>
    %40 = tpu.matmul %39, %38, %cst_12 {dimension_numbers = #tpu.dot_dimension_numbers<[1], [0], [0], [1], [0, 0, 1, 1], [], []>} : vector<8x128xbf16>, vector<128x128xbf16>, vector<8x128xf32> -> vector<8x128xf32>
    %41 = vector.broadcast %4 : vector<1x128xf32> to vector<8x128xf32>
    %42 = arith.addf %40, %41 : vector<8x128xf32>
    %cst_13 = arith.constant 0.000000e+00 : f32
    %43 = vector.broadcast %cst_13 : f32 to vector<8x128xf32>
    %44 = arith.maximumf %42, %43 : vector<8x128xf32>
    %c0_14 = arith.constant 0 : index
    %c256_15 = arith.constant 256 : index
    %45 = vector.load %arg2[%c0_14, %c256_15] : memref<144x384xbf16, #tpu.memory_space<vmem>>, vector<128x128xbf16>
    %46 = arith.truncf %44 : vector<8x128xf32> to vector<8x128xbf16>
    %cst_16 = arith.constant dense<0.000000e+00> : vector<8x128xf32>
    %47 = tpu.matmul %46, %45, %cst_16 {dimension_numbers = #tpu.dot_dimension_numbers<[1], [0], [0], [1], [0, 0, 1, 1], [], []>} : vector<8x128xbf16>, vector<128x128xbf16>, vector<8x128xf32> -> vector<8x128xf32>
    %48 = vector.broadcast %6 : vector<1x128xf32> to vector<8x128xf32>
    %49 = arith.addf %47, %48 : vector<8x128xf32>
    %cst_17 = arith.constant dense<0xFF800000> : vector<8xf32>
    %50 = vector.multi_reduction <maximumf>, %49, %cst_17 [1] : vector<8x128xf32> to vector<8xf32>
    %51 = vector.shape_cast %50 : vector<8xf32> to vector<8x1xf32>
    %52 = vector.broadcast %51 : vector<8x1xf32> to vector<8x128xf32>
    %53 = arith.subf %49, %52 : vector<8x128xf32>
    %54 = math.exp %53 : vector<8x128xf32>
    %cst_18 = arith.constant dense<0.000000e+00> : vector<8xf32>
    %55 = vector.multi_reduction <add>, %54, %cst_18 [1] : vector<8x128xf32> to vector<8xf32>
    %56 = vector.shape_cast %55 : vector<8xf32> to vector<8x1xf32>
    %57 = tpu.reciprocal %56 {approx = true} : vector<8x1xf32> -> vector<8x1xf32>
    %58 = arith.mulf %56, %57 : vector<8x1xf32>
    %cst_19 = arith.constant 2.000000e+00 : f32
    %59 = vector.broadcast %cst_19 : f32 to vector<8x1xf32>
    %60 = arith.subf %59, %58 : vector<8x1xf32>
    %61 = arith.mulf %57, %60 : vector<8x1xf32>
    %62 = vector.broadcast %61 : vector<8x1xf32> to vector<8x128xf32>
    %63 = arith.mulf %54, %62 : vector<8x128xf32>
    %64 = vector.extract_strided_slice %63 {offsets = [0, 0], sizes = [8, 6], strides = [1, 1]} : vector<8x128xf32> to vector<8x6xf32>
    %c0_20 = arith.constant 0 : index
    %c0_21 = arith.constant 0 : index
    %65 = vector.load %arg3[%c0_20, %c0_21] : memref<8x6xf32, #tpu.memory_space<vmem>>, vector<8x6xf32>
    tpu.vector_store %arg3[%c0_20, %c0_21], %64 {strides = array<i32>} : memref<8x6xf32, #tpu.memory_space<vmem>>, vector<8x6xf32>,
    return
  }
  func.func @transform_0(%arg0: i32) -> (i32, i32) {
    %c0_i32 = arith.constant 0 : i32
    %c0_i32_0 = arith.constant 0 : i32
    return %arg0, %c0_i32 : i32, i32
  }
  func.func @transform_1(%arg0: i32) -> (i32, i32) {
    %c0_i32 = arith.constant 0 : i32
    %c0_i32_0 = arith.constant 0 : i32
    %c0_i32_1 = arith.constant 0 : i32
    return %c0_i32, %c0_i32_0 : i32, i32
  }
  func.func @transform_2(%arg0: i32) -> (i32, i32) {
    %c0_i32 = arith.constant 0 : i32
    %c0_i32_0 = arith.constant 0 : i32
    return %arg0, %c0_i32 : i32, i32
  }
}

</mosaic_0001>

<bundles_post_ra>
// kernel: policy_net_forward.1
= control target key start
LH: loop header
LB: loop body
LE: loop exit
PB: predicated region body
PF: predicated region fallthrough
CT: control target
= control target key end

     0   :  { %7 = vsyncpa [#allocation3], 0  ;;  %s559_s0 = inlined_call_operand.vmem [shape: f32[8,4], index: 0, kind: input, shape index: {}]   ;;  %s560_s1 = inlined_call_operand.hbm [shape: bf16[144,384], index: 1, kind: input, shape index: {}]   ;;  %s561_s2 = inlined_call_operand.hbm [shape: f32[8,6], index: 2, kind: output, shape index: {}]  }
   0x1   :  { %8 = vsyncpa [#allocation4], 0  ;;  %s489_s9 = smov [#allocation2]   ;;  %s441_s13 = scalar_lea.hbm %s560_s1, 3456 }
   0x2   :  { %s16_s10 = sshll.u32 %s489_s9, 4  ;;  %p442_p0 = scmp.ne.s32.totalorder %s560_s1, %s441_s13  ;;  %s17_s10 = int_to_ptr.vmem [resolvable:$true] %s16_s10 }
   0x3   :  { %p445_p1 = scmp.lt.u32.totalorder %s441_s13, %s560_s1 }
   0x5   :  { %p447_p2 = pnand %p445_p1, %p442_p0 }
   0x7   :  { %450 = shalt.err (!%p447_p2)
}
   0x8   :  { %s451_s18 = scalar_lea.vmem %s17_s10, 3456  ;;  %p456_p4 = scmp.lt.s32.totalorder %s17_s10, %s17_s10 }
   0x9   :  { %p452_p3 = scmp.ne.s32.totalorder %s17_s10, %s451_s18  ;;  %p457_p5 = scmp.lt.s32.totalorder %s451_s18, %s451_s18 }
   0xb   :  { %p458_p6 = por %p457_p5, %p456_p4 }
   0xd   :  { %p459_p7 = pnand %p458_p6, %p452_p3 }
   0xf   :  { %462 = shalt.err (!%p459_p7)
}
  0x10   :  { %s490_s19 = smov 192   ;;  %s491_s20 = smov 12  }
  0x11   :  { %22 = dma.hbm_to_vmem [thread:$0]  %s560_s1, 3456, %s17_s10, [#allocation3], %s490_s19, %s490_s19, %s491_s20  }
  0x12   :  { %485 = dma.done.wait [#allocation3], 3456  }
  0x13   :  { %486 = vsyncadd [#allocation3], 4294963840  ;;  %v492_v0 = vmov 0   ;;  %v493_v1 = vmov 2   ;;  %v494_v2 = vmov 0.0   ;;  %v27_v3 = vld [vmem:[%s559_s0] sm:$0xff]  ;;  %v41_v20 = vlaneseq }
  0x14   :  { %416 = vset.pattern.permute.xlu0 %v492_v0  ;;  %418 = vset.pattern.permute.xlu1 %v493_v1  ;;  %v421_v4 = vld [vmem:[#allocation2 + $0x4] ss:$12 sps:$4 sm:$0xff]   ;;  %v422_v5 = vld [vmem:[#allocation2 + $0x1c] ss:$12 sps:$4 sm:$0xff]   ;;  %v495_v6 = vmov 1   ;;  %v496_v7 = vmov 3  }
  0x15   :  { %366 = vmatprep.subr.bf16.mxu0 %v494_v2  ;;  %386 = vmatprep.subr.bf16.mxu1 %v494_v2  ;;  %v423_v8 = vld [vmem:[#allocation2 + $0x34] ss:$12 sps:$4 sm:$0xff]   ;;  %v424_v9 = vld [vmem:[#allocation2 + $0x4c] ss:$12 sps:$4 sm:$0xff]   ;;  %v425_v10 = vld [vmem:[#allocation2 + $0x64] ss:$12 sps:$4 sm:$0xff]  }
  0x16   :  { %38 = vperm.xlu0 %416, %v27_v3   ;;  %64 = vperm.xlu1 %418, %v27_v3   ;;  %vm497_vm0 = vmmov 0   ;;  %v429_v11 = vld [vmem:[#allocation2 + $0x8] ss:$12 sps:$4 sm:$0xff]   ;;  %v430_v13 = vld [vmem:[#allocation2 + $0x20] ss:$12 sps:$4 sm:$0xff]   ;;  %v42_v21 = vshrl.u32 %v41_v20, 7 }
  0x17   :  { %367 = vmatpush3.bf16.msra.mxu0 %v421_v4  ;;  %382 = vmatprep.mubr.msk.bf16.mxu0 %vm497_vm0, %v494_v2  ;;  %v426_v12 = vld [vmem:[#allocation2 + $0x7c] ss:$12 sps:$4 sm:$0xff]   ;;  %v427_v14 = vld [vmem:[#allocation2 + $0x94] ss:$12 sps:$4 sm:$0xff]   ;;  %v431_v15 = vld [vmem:[#allocation2 + $0x38] ss:$12 sps:$4 sm:$0xff]  }
  0x18   :  { %368 = vmatprep.subr.bf16.mxu0 %v494_v2  ;;  %402 = vmatprep.mubr.msk.bf16.mxu1 %vm497_vm0, %v494_v2  ;;  %v428_v16 = vld [vmem:[#allocation2 + $0xac] ss:$12 sps:$4 sm:$0xff]   ;;  %v432_v17 = vld [vmem:[#allocation2 + $0x50] ss:$12 sps:$4 sm:$0xff]   ;;  %v433_v18 = vld [vmem:[#allocation2 + $0x68] ss:$12 sps:$4 sm:$0xff]  }
  0x19   :  { %387 = vmatpush3.bf16.msra.mxu1 %v429_v11  ;;  %v434_v19 = vld [vmem:[#allocation2 + $0x80] ss:$12 sps:$4 sm:$0xff]   ;;  %v43_v24 = vsub.s32 0, %v42_v21  ;;  %v57_v29 = vsub.s32 1, %v42_v21  ;;  %v69_v32 = vsub.s32 2, %v42_v21  ;;  %v79_v34 = vsub.s32 3, %v42_v21 }
  0x1a   :  { %417 = vset.pattern.permute.xlu0 %v495_v6  ;;  %419 = vset.pattern.permute.xlu1 %v496_v7  ;;  %v34_v22 = vld [vmem:[#allocation2] sm:$0x1]  ;;  %v61_v26 = vld [vmem:[#allocation2] sm:$0x2]  ;;  %v435_v51 = vld [vmem:[#allocation2 + $0x98] ss:$12 sps:$4 sm:$0xff]  }
  0x1b   :  { %52 = vperm.xlu0 %417, %v27_v3   ;;  %74 = vperm.xlu1 %419, %v27_v3   ;;  %v35_v23 = vunpack.c.l.bf16 %v34_v22  ;;  %v28_v25 = vld [vmem:[#allocation2 + $0xc0] sm:$0x1]  ;;  %v62_v31 = vunpack.c.l.bf16 %v61_v26  ;;  %v436_v52 = vld [vmem:[#allocation2 + $0xb0] ss:$12 sps:$4 sm:$0xff]   ;;  %v30_v53 = vld [vmem:[#allocation2 + $0xc4] sm:$0x1] }
  0x1c   :  { %369 = vmatpush3.bf16.msra.mxu0 %v422_v5  ;;  %388 = vmatprep.subr.bf16.mxu1 %v494_v2  ;;  %v29_v27 = vunpack.c.l.bf16 %v28_v25  ;;  %v31_v54 = vunpack.c.l.bf16 %v30_v53  ;;  %v32_v63 = vld [vmem:[#allocation2 + $0xc8] sm:$0x1]  ;;  %s498_s0 = smov [#allocation5]   ;;  %vm315_vm1 = vcmask 48128  }
  0x1d   :  { %370 = vmatprep.subr.bf16.mxu0 %v494_v2  ;;  %389 = vmatpush3.bf16.msra.mxu1 %v430_v13  ;;  %v44_v28 = vrot.slane %v35_v23, %v43_v24  ;;  %v58_v37 = vrot.slane %v35_v23, %v57_v29  ;;  %v70_v38 = vrot.slane %v62_v31, %v69_v32  ;;  %v33_v0 = vunpack.c.l.bf16 %v32_v63  ;;  %s323_s1 = sshll.u32 %s498_s0, 4  ;;  %s324_s1 = int_to_ptr.vmem [resolvable:$true] %s323_s1 }
  0x1e   :  { %390 = vmatprep.subr.bf16.mxu1 %v494_v2  ;;  %v49_v35 = vrot.slane %v29_v27, %v43_v24  ;;  %v80_v39 = vrot.slane %v62_v31, %v79_v34  ;;  %v104_v55 = vrot.slane %v31_v54, %v43_v24  ;;  %s463_s25 = scalar_lea.vmem %s324_s1, 128  ;;  %p468_p9 = scmp.lt.s32.totalorder %s324_s1, %s324_s1 }
  0x1f   :  { %420 = vset.pattern.permute.xlu0 %v496_v7  ;;  %v214_v1 = vrot.slane %v33_v0, %v43_v24  ;;  %p464_p8 = scmp.ne.s32.totalorder %s324_s1, %s463_s25  ;;  %p469_p10 = scmp.lt.s32.totalorder %s463_s25, %s463_s25 }
  0x20   :  { %371 = vmatpush3.bf16.msra.mxu0 %v423_v8 }
  0x21   :  { %372 = vmatprep.subr.bf16.mxu0 %v494_v2  ;;  %391 = vmatpush3.bf16.msra.mxu1 %v431_v15  ;;  %p470_p11 = por %p469_p10, %p468_p9 }
  0x22   :  { %392 = vmatprep.subr.bf16.mxu1 %v494_v2 }
  0x23   :  { %p471_p12 = pnand %p470_p11, %p464_p8 }
  0x24   :  { %373 = vmatpush3.bf16.msra.mxu0 %v424_v9 }
  0x25   :  { %374 = vmatprep.subr.bf16.mxu0 %v494_v2  ;;  %393 = vmatpush3.bf16.msra.mxu1 %v432_v17 }
  0x26   :  { %394 = vmatprep.subr.bf16.mxu1 %v494_v2 }
  0x28   :  { %375 = vmatpush3.bf16.msra.mxu0 %v425_v10 }
  0x29   :  { %376 = vmatprep.subr.bf16.mxu0 %v494_v2  ;;  %395 = vmatpush3.bf16.msra.mxu1 %v433_v18 }
  0x2a   :  { %396 = vmatprep.subr.bf16.mxu1 %v494_v2 }
  0x2c   :  { %377 = vmatpush3.bf16.msra.mxu0 %v426_v12 }
  0x2d   :  { %378 = vmatprep.subr.bf16.mxu0 %v494_v2  ;;  %397 = vmatpush3.bf16.msra.mxu1 %v434_v19 }
  0x2e   :  { %398 = vmatprep.subr.bf16.mxu1 %v494_v2 }
  0x30   :  { %379 = vmatpush3.bf16.msra.mxu0 %v427_v14 }
  0x31   :  { %380 = vmatprep.subr.bf16.mxu0 %v494_v2  ;;  %399 = vmatpush3.bf16.msra.mxu1 %v435_v51 }
  0x32   :  { %400 = vmatprep.subr.bf16.mxu1 %v494_v2 }
  0x34   :  { %381 = vmatpush3.bf16.msra.mxu0 %v428_v16 }
  0x35   :  { %401 = vmatpush3.bf16.msra.mxu1 %v436_v52 }
  0x95   :  { %v39_v30 = vpop.permute.xlu0 %38  ;;  %v65_v33 = vpop.permute.xlu1 %64 }
  0x96   :  { %v45_v36 = vmul.f32 %v44_v28, %v39_v30  ;;  %v71_v44 = vmul.f32 %v70_v38, %v65_v33 }
  0x98   :  { %v50_v42 = vadd.f32 %v49_v35, %v45_v36 }
  0x9a   :  { %v53_v40 = vpop.permute.xlu0 %52  ;;  %v75_v41 = vpop.permute.xlu1 %74 }
  0x9b   :  { %v59_v43 = vmul.f32 %v58_v37, %v53_v40  ;;  %v81_v46 = vmul.f32 %v80_v39, %v75_v41 }
  0x9d   :  { %v60_v45 = vadd.f32 %v59_v43, %v50_v42 }
  0x9f   :  { %v72_v47 = vadd.f32 %v71_v44, %v60_v45 }
  0xa1   :  { %v82_v48 = vadd.f32 %v81_v46, %v72_v47 }
  0xa3   :  { %v83_v49 = vmax.f32 %v82_v48, 0.0 }
  0xa5   :  { %v100_v50 = vpack.c.bf16 %v83_v49, %v83_v49 }
  0xa7   :  { %383 = vmatmul.mubr.bf16.vlgmr.msra.gmra.mrb[0].mxu0 %v100_v50 }
 0x17a   :  { %v187_v56 = vpop.f32.mrb[0].mxu0 }
 0x17b   :  { %v188_v57 = vadd.f32 %v187_v56, %v104_v55  ;;  %v384_v58 = vpop.f32.mrb[1].mxu0 }
 0x17c   :  { %v190_v59 = vpop.f32.mrb[2].mxu0 }
 0x17d   :  { %v193_v60 = vmax.f32 %v188_v57, 0.0  ;;  %v385_v61 = vpop.f32.mrb[3].mxu0 }
 0x17f   :  { %v210_v62 = vpack.c.bf16 %v193_v60, %v193_v60 }
 0x181   :  { %403 = vmatmul.mubr.bf16.vlgmr.msra.gmra.mrb[0].mxu1 %v210_v62 }
 0x254   :  { %v297_v3 = vpop.f32.mrb[0].mxu1 }
 0x255   :  { %v298_v4 = vadd.f32 %v297_v3, %v214_v1  ;;  %v404_v5 = vpop.f32.mrb[1].mxu1 }
 0x256   :  { %v300_v2 = vpop.f32.mrb[2].mxu1 }
 0x257   :  { %303 = vmax.xlane.f32.xlu1 %v298_v4  ;;  %v405_v6 = vpop.f32.mrb[3].mxu1 }
 0x2e4   :  { %v304_v7 = vpop.xlane.xlu1 %303 }
 0x2e5   :  { %v305_v8 = vsub.f32 %v298_v4, %v304_v7 }
 0x2e7   :  { %v306_v9 = vmul.f32 1.442695, %v305_v8 }
 0x2e9   :  { %437 = vpow2.f32 %v306_v9 }
 0x2f3   :  { %v438_v10 = vpop.eup %437 }
 0x2f4   :  { %308 = vadd.xlane.f32.xlu0 %v438_v10 }
 0x381   :  { %v309_v11 = vpop.xlane.xlu0 %308 }
 0x382   :  { %439 = vrcp.f32 %v309_v11 }
 0x38c   :  { %v440_v12 = vpop.eup %439 }
 0x38d   :  { %v311_v13 = vmul.f32 %v440_v12, %v309_v11 }
 0x38f   :  { %v312_v14 = vsub.f32 2.0, %v311_v13 }
 0x391   :  { %v313_v15 = vmul.f32 %v440_v12, %v312_v14 }
 0x393   :  { %v314_v16 = vmul.f32 %v438_v10, %v313_v15 }
 0x395   :  { %316 = vst.msk [vmem:[#allocation5] sm:$0xff] %vm315_vm1, %v314_v16 }
 0x396   :  { %474 = shalt.err (!%p471_p12)
}
 0x397   :  { %s475_s28 = scalar_lea.hbm %s561_s2, 128 }
 0x398   :  { %p476_p13 = scmp.ne.s32.totalorder %s561_s2, %s475_s28  ;;  %p479_p0 = scmp.lt.u32.totalorder %s475_s28, %s561_s2 }
 0x39a   :  { %p481_p1 = pnand %p479_p0, %p476_p13 }
 0x39c   :  { %484 = shalt.err (!%p481_p1)
}
 0x39d   :  { %326 = dma.vmem_to_hbm [thread:$0]  %s324_s1, 128, %s561_s2, [#allocation4]  }
 0x39e   :  { %487 = dma.done.wait [#allocation4], 128  }
 0x39f   :  { %488 = vsyncadd [#allocation4], 4294967168 }
 0x3a0   :  { %330 = vsyncpa [#allocation3], 1 }
 0x3a1   :  { %331 = vsyncpa [#allocation4], 1 }

</bundles_post_ra>
